<compile_context>
chip_gen: v7x
topology: tpu7x:2x2x1
jax: 0.10.0
libtpu: 0.0.40
codegen_flags: <defaults>
</compile_context>

<pallas_src>
import jax
import jax.numpy as jnp
from jax import lax
from jax.experimental import pallas as pl
from jax.experimental.pallas import tpu as pltpu

_MIB = 1024 * 1024


def _tpu_vmem_and_cores():
    """Best-effort, generation-aware VMEM capacity + TensorCore count."""
    vmem_cap = 64 * _MIB  # conservative default = v7x per-core VMEM
    try:
        info = pltpu.get_tpu_info()
        cap = getattr(info, "vmem_capacity_bytes", None)
        if cap:
            vmem_cap = int(cap)
    except Exception:
        pass
    vmem_cap = min(max(vmem_cap, 64 * _MIB), 128 * _MIB)
    # Heuristic: 64 MiB/TC chips (v7x) have 2 TensorCores/chip; 128 MiB chips (v5e/v6e) have 1.
    num_cores = 2 if vmem_cap <= 64 * _MIB else 1
    return vmem_cap, num_cores


def _choose_batch_tile(n, per_sample_bytes, budget_bytes, num_cores):
    """Largest divisor-of-n batch tile fitting the VMEM budget; on multi-TC chips keep at
    least `num_cores` grid steps (when possible) so every TensorCore gets work."""
    best = 1
    for bt in range(1, n + 1):
        if n % bt:
            continue
        steps = n // bt
        if num_cores > 1 and n >= num_cores and steps < num_cores:
            continue
        if bt * per_sample_bytes <= budget_bytes:
            best = bt
    return best


def fused_patchconv_gelu_grn_detail(x_s2d, w2, b2, grn_gamma, grn_beta, det_w, det_b,
                                    h_feat, w_feat):
    """Fused patch-conv (MXU matmul) -> GELU -> GRN -> (Identity, 1x1 conv + sigmoid).

    x_s2d : (N, K, S) space-to-depth input, K = 3*patch^2, S = h_feat*w_feat.
    Returns feature (N, Cp, h_feat, w_feat) and detail (N, 1, h_feat, w_feat)."""
    N, K, S = x_s2d.shape
    Cp = w2.shape[0]
    assert S == h_feat * w_feat
    assert grn_gamma.shape[-2:] == (h_feat, w_feat) and grn_beta.shape[-2:] == (h_feat, w_feat)

    io_dtype = x_s2d.dtype
    itemsize = jnp.dtype(io_dtype).itemsize

    # Lane-dense minor dim: pad S to a multiple of 128 (unmasked full-width stores).
    S_pad = ((S + 127) // 128) * 128
    pad = S_pad - S
    if pad:
        x_s2d = jnp.pad(x_s2d, ((0, 0), (0, 0), (0, pad)))

    gamma = jnp.pad(grn_gamma.reshape(1, S).astype(jnp.float32), ((0, 0), (0, pad)))
    beta = jnp.pad(grn_beta.reshape(1, S).astype(jnp.float32), ((0, 0), (0, pad)))
    w2m = w2.reshape(Cp, K).astype(io_dtype)
    b2v = b2.reshape(Cp, 1).astype(jnp.float32)
    w3v = det_w.reshape(Cp, 1).astype(jnp.float32)
    b3v = det_b.reshape(1, 1).astype(jnp.float32)

    # bf16 elementwise compute on bf16 I/O (v6e/v7x have bf16 VPU/EUP); reductions, the
    # spatial mean and reciprocals stay f32.
    # TODO(synk): keep f32 elementwise on v5e (no bf16 VALU/EUP) once chip-kind detection
    # is plumbed through; bf16 there still compiles, it just inserts converts.
    ew_dtype = jnp.bfloat16 if io_dtype == jnp.bfloat16 else jnp.float32

    vmem_cap, num_cores = _tpu_vmem_and_cores()
    vmem_limit = int(vmem_cap) * 3 // 4            # ~96 MiB on v5e/v6e, ~48 MiB on v7x
    budget = vmem_limit - 6 * _MIB                 # headroom: param blocks + compiler scratch
    # Honest footprint: double-buffered I/O blocks + ~3 live f32 (Cp, S) temporaries/sample.
    per_sample = 2 * (K * S_pad + Cp * S_pad + S_pad) * itemsize + 3 * Cp * S_pad * 4
    if per_sample > budget:
        # TODO(synk): spatially-tiled two-pass GRN (accumulate gx over S tiles, then apply)
        # for samples whose footprint exceeds VMEM; fall back to bt=1 here.
        bt = 1
    else:
        bt = _choose_batch_tile(N, per_sample, budget, num_cores)
    grid = (N // bt,)

    def kernel(x_ref, w2_ref, b2_ref, gamma_ref, beta_ref, w3_ref, b3_ref,
               feat_ref, det_ref):
        w2k = w2_ref[...]                                 # (Cp, K)  io dtype
        b2k = b2_ref[...]                                 # (Cp, 1)  f32
        gam = gamma_ref[...]                              # (1, Sp)  f32
        bet = beta_ref[...]                               # (1, Sp)  f32
        w3k = w3_ref[...]                                 # (Cp, 1)  f32
        b3k = b3_ref[...]                                 # (1, 1)   f32

        if S_pad != S:
            lane = lax.broadcasted_iota(jnp.int32, (1, S_pad), 1)
            lane_valid = lane < S

        for b in range(bt):                               # static unroll; bt is VMEM-limited
            # Patch conv as an MXU matmul: (Cp, K) @ (K, Sp), f32 accumulation.
            h = jnp.dot(w2k, x_ref[b], preferred_element_type=jnp.float32) + b2k
            # GELU (tanh approximation; tanh runs on the EUP).
            # TODO(synk): PyTorch nn.GELU() default is the exact erf form.
            hh = h.astype(ew_dtype)
            y = 0.5 * hh * (1.0 + jnp.tanh(0.7978845608028654 *
                                           (hh + 0.044715 * hh * hh * hh)))
            # GRN (spatial diversification): channel L2 norm, spatial mean (true S, padded
            # lanes masked out), modulation.
            yf = y.astype(jnp.float32)
            gx = jnp.sqrt(jnp.sum(yf * yf, axis=0, keepdims=True))          # (1, Sp)
            gx_m = gx if S_pad == S else jnp.where(lane_valid, gx, 0.0)
            gmean = jnp.sum(gx_m, axis=-1, keepdims=True) * (1.0 / S) + 1e-6
            inv = pl.reciprocal(gmean, approx=True)                          # EUP vrcp
            inv = inv * (2.0 - gmean * inv)                                  # Newton -> ~f32
            nx = gx * inv                                                    # (1, Sp)
            # gamma*(y*nx) + beta + y  ==  y*(gamma*nx + 1) + beta
            scale = (gam * nx + 1.0).astype(ew_dtype)
            grn = y * scale + bet.astype(ew_dtype)                           # (Cp, Sp)
            feat_ref[b] = grn.astype(feat_ref.dtype)
            # Detail branch: 1x1 conv to one channel + sigmoid (reciprocal on the EUP).
            pre = jnp.sum(grn.astype(jnp.float32) * w3k, axis=0, keepdims=True) + b3k
            den = 1.0 + jnp.exp(-pre)
            sinv = pl.reciprocal(den, approx=True)
            sinv = sinv * (2.0 - den * sinv)
            det_ref[b] = sinv.astype(det_ref.dtype)

    feat_out, det_out = pl.pallas_call(
        kernel,
        out_shape=(jax.ShapeDtypeStruct((N, Cp, S_pad), io_dtype),
                   jax.ShapeDtypeStruct((N, 1, S_pad), io_dtype)),
        grid=grid,
        in_specs=[
            pl.BlockSpec((bt, K, S_pad), lambda n: (n, 0, 0)),
            pl.BlockSpec((Cp, K), lambda n: (0, 0)),
            pl.BlockSpec((Cp, 1), lambda n: (0, 0)),
            pl.BlockSpec((1, S_pad), lambda n: (0, 0)),
            pl.BlockSpec((1, S_pad), lambda n: (0, 0)),
            pl.BlockSpec((Cp, 1), lambda n: (0, 0)),
            pl.BlockSpec((1, 1), lambda n: (0, 0)),
        ],
        out_specs=(
            pl.BlockSpec((bt, Cp, S_pad), lambda n: (n, 0, 0)),
            pl.BlockSpec((bt, 1, S_pad), lambda n: (n, 0, 0)),
        ),
        compiler_params=pltpu.CompilerParams(
            dimension_semantics=("parallel",),
            vmem_limit_bytes=vmem_limit,
        ),
    )(x_s2d, w2m, b2v, gamma, beta, w3v, b3v)

    feature = feat_out[:, :, :S].reshape(N, Cp, h_feat, w_feat)
    detail = det_out[:, :, :S].reshape(N, 1, h_feat, w_feat)
    return feature, detail


# ---------------- plain-JAX glue for the rest of ResPatchConv ----------------

def _conv2d(x, w, b, stride):
    out = lax.conv_general_dilated(
        x, w, window_strides=(stride, stride), padding="VALID",
        dimension_numbers=("NCHW", "OIHW", "NCHW"),
        precision=lax.Precision.HIGHEST)
    return out + b.reshape(1, -1, 1, 1)


def _gelu_tanh(x):
    c = 0.7978845608028654
    return 0.5 * x * (1.0 + jnp.tanh(c * (x + 0.044715 * x * x * x)))


def res_patch_conv_forward(params, x, feat, act_dtype=None):
    """ResPatchConv.forward: returns (feature_output, detail_output)."""
    if x.ndim == 3:
        x = x[None]
    N, _, H, W = x.shape
    p = params["patch"]
    hf, wf = H // p, W // p
    up = jax.image.resize(feat, (feat.shape[0], feat.shape[1], H, W),
                          method="bilinear", antialias=False)
    xin = jnp.concatenate([x, up], axis=1)
    h1 = _conv2d(xin, params["w1"], params["b1"], stride=1)               # (N, 3, H, W)
    # Space-to-depth so the patch conv becomes an in-kernel MXU matmul.
    c_in = h1.shape[1]
    x_s2d = (h1.reshape(N, c_in, hf, p, wf, p)
               .transpose(0, 1, 3, 5, 2, 4)
               .reshape(N, c_in * p * p, hf * wf))
    if act_dtype is not None:
        x_s2d = x_s2d.astype(act_dtype)
    w2 = params["w2"].reshape(params["w2"].shape[0], -1)                   # (Cp, 3*p*p)
    return fused_patchconv_gelu_grn_detail(
        x_s2d, w2, params["b2"], params["grn_gamma"], params["grn_beta"],
        params["w3"], params["b3"], hf, wf)


def res_patch_conv_reference(params, x, feat):
    """Pure-jnp reference (no Pallas, conv-based patch conv) of the same forward pass."""
    if x.ndim == 3:
        x = x[None]
    up = jax.image.resize(feat, (feat.shape[0], feat.shape[1], x.shape[2], x.shape[3]),
                          method="bilinear", antialias=False)
    xin = jnp.concatenate([x, up], axis=1)
    h = _conv2d(xin, params["w1"], params["b1"], stride=1)
    h = _conv2d(h, params["w2"], params["b2"], stride=params["patch"])
    h = _gelu_tanh(h)
    gx = jnp.sqrt(jnp.sum(h * h, axis=1, keepdims=True))
    nx = gx / (jnp.mean(gx, axis=(-1, -2), keepdims=True) + 1e-6)
    grn = params["grn_gamma"] * (h * nx) + params["grn_beta"] + h
    det = 1.0 / (1.0 + jnp.exp(-_conv2d(grn, params["w3"], params["b3"], stride=1)))
    return grn, det


if __name__ == "__main__":
    key = jax.random.PRNGKey(0)
    ks = jax.random.split(key, 10)

    N = 2
    C_IN = 3
    DIM_PATCH = 32            # dim_patch_feature (small for the smoke test)
    PATCH = 2
    H_IN = W_IN = 32          # -> h_feat = w_feat = 16, S = 256 (lane-dense minor dim)
    H_FEAT, W_FEAT = H_IN // PATCH, W_IN // PATCH

    x = jax.random.normal(ks[0], (N, C_IN, H_IN, W_IN), dtype=jnp.float32)
    feat = jax.random.normal(ks[1], (N, DIM_PATCH, 8, 8), dtype=jnp.float32)

    params = {
        "patch": PATCH,
        "w1": 0.1 * jax.random.normal(ks[2], (C_IN, C_IN + DIM_PATCH, 1, 1), jnp.float32),
        "b1": 0.1 * jax.random.normal(ks[3], (C_IN,), jnp.float32),
        "w2": 0.1 * jax.random.normal(ks[4], (DIM_PATCH, C_IN, PATCH, PATCH), jnp.float32),
        "b2": 0.1 * jax.random.normal(ks[5], (DIM_PATCH,), jnp.float32),
        # GRN params are zero-initialized in PyTorch; use non-trivial values so the
        # normalization path is actually exercised by the test.
        "grn_gamma": 0.1 * jax.random.normal(ks[6], (1, 1, H_FEAT, W_FEAT), jnp.float32),
        "grn_beta": 0.1 * jax.random.normal(ks[7], (1, 1, H_FEAT, W_FEAT), jnp.float32),
        "w3": 0.1 * jax.random.normal(ks[8], (1, DIM_PATCH, 1, 1), jnp.float32),
        "b3": 0.1 * jax.random.normal(ks[9], (1,), jnp.float32),
    }

    feature_output, detail_output = res_patch_conv_forward(params, x, feat)
    jax.block_until_ready((feature_output, detail_output))

    ref_feat, ref_det = res_patch_conv_reference(params, x, feat)
    assert feature_output.shape == (N, DIM_PATCH, H_FEAT, W_FEAT)
    assert detail_output.shape == (N, 1, H_FEAT, W_FEAT)
    # Tolerance allows for MXU f32 multi-pass rounding differences between the in-kernel
    # dot and the XLA reference convolution.
    assert jnp.allclose(feature_output, ref_feat, atol=2e-3, rtol=2e-3), "feature mismatch (f32)"
    assert jnp.allclose(detail_output, ref_det, atol=2e-3, rtol=2e-3), "detail mismatch (f32)"

    # bf16 activation path (exercises the bf16 elementwise branch of the kernel).
    feat_bf, det_bf = res_patch_conv_forward(params, x, feat, act_dtype=jnp.bfloat16)
    jax.block_until_ready((feat_bf, det_bf))
    assert feat_bf.dtype == jnp.bfloat16 and det_bf.dtype == jnp.bfloat16
    assert jnp.allclose(feat_bf.astype(jnp.float32), ref_feat, atol=1e-1, rtol=1e-1), \
        "feature mismatch (bf16)"
    assert jnp.allclose(det_bf.astype(jnp.float32), ref_det, atol=1e-1, rtol=1e-1), \
        "detail mismatch (bf16)"

    print("KERNEL_OK")
</pallas_src>

<mosaic_0001>
module attributes {stable_mosaic.version = 11 : i64} {
  func.func @kernel(%arg0: i32, %arg1: memref<1x12x256xf32, #tpu.memory_space<vmem>>, %arg2: memref<32x12xf32, #tpu.memory_space<vmem>>, %arg3: memref<32x1xf32, #tpu.memory_space<vmem>>, %arg4: memref<1x256xf32, #tpu.memory_space<vmem>>, %arg5: memref<1x256xf32, #tpu.memory_space<vmem>>, %arg6: memref<32x1xf32, #tpu.memory_space<vmem>>, %arg7: memref<1x1xf32, #tpu.memory_space<vmem>>, %arg8: memref<1x32x256xf32, #tpu.memory_space<vmem>>, %arg9: memref<1x1x256xf32, #tpu.memory_space<vmem>>) attributes {dimension_semantics = [#tpu.dimension_semantics<parallel>], iteration_bounds = array<i64: 2>, scalar_prefetch = 0 : i64, scratch_operands = 0 : i64, tpu.core_type = #tpu.core_type<tc>, window_params = [{transform_indices = @transform_0, window_bounds = array<i64: 1, 12, 256>}, {pipeline_mode = #tpu.pipeline_mode<synchronous>, transform_indices = @transform_1, window_bounds = array<i64: 32, 12>}, {pipeline_mode = #tpu.pipeline_mode<synchronous>, transform_indices = @transform_2, window_bounds = array<i64: 32, 1>}, {pipeline_mode = #tpu.pipeline_mode<synchronous>, transform_indices = @transform_3, window_bounds = array<i64: 1, 256>}, {pipeline_mode = #tpu.pipeline_mode<synchronous>, transform_indices = @transform_4, window_bounds = array<i64: 1, 256>}, {pipeline_mode = #tpu.pipeline_mode<synchronous>, transform_indices = @transform_5, window_bounds = array<i64: 32, 1>}, {pipeline_mode = #tpu.pipeline_mode<synchronous>, transform_indices = @transform_6, window_bounds = array<i64: 1, 1>}, {transform_indices = @transform_7, window_bounds = array<i64: 1, 32, 256>}, {transform_indices = @transform_8, window_bounds = array<i64: 1, 1, 256>}]} {
    %c0 = arith.constant 0 : index
    %c0_0 = arith.constant 0 : index
    %0 = vector.load %arg2[%c0, %c0_0] : memref<32x12xf32, #tpu.memory_space<vmem>>, vector<32x12xf32>
    %c0_1 = arith.constant 0 : index
    %c0_2 = arith.constant 0 : index
    %1 = vector.load %arg3[%c0_1, %c0_2] : memref<32x1xf32, #tpu.memory_space<vmem>>, vector<32x1xf32>
    %c0_3 = arith.constant 0 : index
    %c0_4 = arith.constant 0 : index
    %2 = vector.load %arg4[%c0_3, %c0_4] : memref<1x256xf32, #tpu.memory_space<vmem>>, vector<1x256xf32>
    %c0_5 = arith.constant 0 : index
    %c0_6 = arith.constant 0 : index
    %3 = vector.load %arg5[%c0_5, %c0_6] : memref<1x256xf32, #tpu.memory_space<vmem>>, vector<1x256xf32>
    %c0_7 = arith.constant 0 : index
    %c0_8 = arith.constant 0 : index
    %4 = vector.load %arg6[%c0_7, %c0_8] : memref<32x1xf32, #tpu.memory_space<vmem>>, vector<32x1xf32>
    %c0_9 = arith.constant 0 : index
    %c0_10 = arith.constant 0 : index
    %5 = vector.load %arg7[%c0_9, %c0_10] : memref<1x1xf32, #tpu.memory_space<vmem>>, vector<1x1xf32>
    %c0_11 = arith.constant 0 : index
    %c0_12 = arith.constant 0 : index
    %c0_13 = arith.constant 0 : index
    %6 = vector.load %arg1[%c0_11, %c0_12, %c0_13] : memref<1x12x256xf32, #tpu.memory_space<vmem>>, vector<1x12x256xf32>
    %7 = vector.shape_cast %6 : vector<1x12x256xf32> to vector<12x256xf32>
    %cst = arith.constant dense<0.000000e+00> : vector<32x256xf32>
    %8 = tpu.matmul %0, %7, %cst {dimension_numbers = #tpu.dot_dimension_numbers<[1], [0], [0], [1], [0, 0, 1, 1], [], []>} : vector<32x12xf32>, vector<12x256xf32>, vector<32x256xf32> -> vector<32x256xf32>
    %9 = vector.broadcast %1 : vector<32x1xf32> to vector<32x256xf32>
    %10 = arith.addf %8, %9 : vector<32x256xf32>
    %cst_14 = arith.constant 5.000000e-01 : f32
    %11 = vector.broadcast %cst_14 : f32 to vector<32x256xf32>
    %12 = arith.mulf %11, %10 : vector<32x256xf32>
    %cst_15 = arith.constant 4.471500e-02 : f32
    %13 = vector.broadcast %cst_15 : f32 to vector<32x256xf32>
    %14 = arith.mulf %13, %10 : vector<32x256xf32>
    %15 = arith.mulf %14, %10 : vector<32x256xf32>
    %16 = arith.mulf %15, %10 : vector<32x256xf32>
    %17 = arith.addf %10, %16 : vector<32x256xf32>
    %cst_16 = arith.constant 0.797884583 : f32
    %18 = vector.broadcast %cst_16 : f32 to vector<32x256xf32>
    %19 = arith.mulf %18, %17 : vector<32x256xf32>
    %20 = math.tanh %19 : vector<32x256xf32>
    %cst_17 = arith.constant 1.000000e+00 : f32
    %21 = vector.broadcast %cst_17 : f32 to vector<32x256xf32>
    %22 = arith.addf %21, %20 : vector<32x256xf32>
    %23 = arith.mulf %12, %22 : vector<32x256xf32>
    %24 = arith.mulf %23, %23 : vector<32x256xf32>
    %cst_18 = arith.constant dense<0.000000e+00> : vector<256xf32>
    %25 = vector.multi_reduction <add>, %24, %cst_18 [0] : vector<32x256xf32> to vector<256xf32>
    %26 = vector.shape_cast %25 : vector<256xf32> to vector<1x256xf32>
    %27 = math.sqrt %26 : vector<1x256xf32>
    %cst_19 = arith.constant dense<0.000000e+00> : vector<1xf32>
    %28 = vector.multi_reduction <add>, %27, %cst_19 [1] : vector<1x256xf32> to vector<1xf32>
    %29 = vector.shape_cast %28 : vector<1xf32> to vector<1x1xf32>
    %cst_20 = arith.constant 3.906250e-03 : f32
    %30 = vector.broadcast %cst_20 : f32 to vector<1x1xf32>
    %31 = arith.mulf %29, %30 : vector<1x1xf32>
    %cst_21 = arith.constant 9.99999997E-7 : f32
    %32 = vector.broadcast %cst_21 : f32 to vector<1x1xf32>
    %33 = arith.addf %31, %32 : vector<1x1xf32>
    %34 = tpu.reciprocal %33 {approx = true} : vector<1x1xf32> -> vector<1x1xf32>
    %35 = arith.mulf %33, %34 : vector<1x1xf32>
    %cst_22 = arith.constant 2.000000e+00 : f32
    %36 = vector.broadcast %cst_22 : f32 to vector<1x1xf32>
    %37 = arith.subf %36, %35 : vector<1x1xf32>
    %38 = arith.mulf %34, %37 : vector<1x1xf32>
    %39 = vector.broadcast %38 : vector<1x1xf32> to vector<1x256xf32>
    %40 = arith.mulf %27, %39 : vector<1x256xf32>
    %41 = arith.mulf %2, %40 : vector<1x256xf32>
    %cst_23 = arith.constant 1.000000e+00 : f32
    %42 = vector.broadcast %cst_23 : f32 to vector<1x256xf32>
    %43 = arith.addf %41, %42 : vector<1x256xf32>
    %44 = vector.broadcast %43 : vector<1x256xf32> to vector<32x256xf32>
    %45 = arith.mulf %23, %44 : vector<32x256xf32>
    %46 = vector.broadcast %3 : vector<1x256xf32> to vector<32x256xf32>
    %47 = arith.addf %45, %46 : vector<32x256xf32>
    %c0_24 = arith.constant 0 : index
    %c0_25 = arith.constant 0 : index
    %c0_26 = arith.constant 0 : index
    %48 = vector.load %arg8[%c0_24, %c0_25, %c0_26] : memref<1x32x256xf32, #tpu.memory_space<vmem>>, vector<1x32x256xf32>
    %49 = vector.shape_cast %48 : vector<1x32x256xf32> to vector<32x256xf32>
    %50 = vector.shape_cast %47 : vector<32x256xf32> to vector<1x32x256xf32>
    tpu.vector_store %arg8[%c0_24, %c0_25, %c0_26], %50 {strides = array<i32>} : memref<1x32x256xf32, #tpu.memory_space<vmem>>, vector<1x32x256xf32>,
    %51 = vector.broadcast %4 : vector<32x1xf32> to vector<32x256xf32>
    %52 = arith.mulf %47, %51 : vector<32x256xf32>
    %cst_27 = arith.constant dense<0.000000e+00> : vector<256xf32>
    %53 = vector.multi_reduction <add>, %52, %cst_27 [0] : vector<32x256xf32> to vector<256xf32>
    %54 = vector.shape_cast %53 : vector<256xf32> to vector<1x256xf32>
    %55 = vector.broadcast %5 : vector<1x1xf32> to vector<1x256xf32>
    %56 = arith.addf %54, %55 : vector<1x256xf32>
    %cst_28 = arith.constant 0.000000e+00 : f32
    %57 = vector.broadcast %cst_28 : f32 to vector<1x256xf32>
    %58 = arith.subf %57, %56 : vector<1x256xf32>
    %59 = math.exp %58 : vector<1x256xf32>
    %cst_29 = arith.constant 1.000000e+00 : f32
    %60 = vector.broadcast %cst_29 : f32 to vector<1x256xf32>
    %61 = arith.addf %60, %59 : vector<1x256xf32>
    %62 = tpu.reciprocal %61 {approx = true} : vector<1x256xf32> -> vector<1x256xf32>
    %63 = arith.mulf %61, %62 : vector<1x256xf32>
    %cst_30 = arith.constant 2.000000e+00 : f32
    %64 = vector.broadcast %cst_30 : f32 to vector<1x256xf32>
    %65 = arith.subf %64, %63 : vector<1x256xf32>
    %66 = arith.mulf %62, %65 : vector<1x256xf32>
    %c0_31 = arith.constant 0 : index
    %c0_32 = arith.constant 0 : index
    %c0_33 = arith.constant 0 : index
    %67 = vector.load %arg9[%c0_31, %c0_32, %c0_33] : memref<1x1x256xf32, #tpu.memory_space<vmem>>, vector<1x1x256xf32>
    %68 = vector.shape_cast %67 : vector<1x1x256xf32> to vector<1x256xf32>
    %69 = vector.shape_cast %66 : vector<1x256xf32> to vector<1x1x256xf32>
    tpu.vector_store %arg9[%c0_31, %c0_32, %c0_33], %69 {strides = array<i32>} : memref<1x1x256xf32, #tpu.memory_space<vmem>>, vector<1x1x256xf32>,
    return
  }
  func.func @transform_0(%arg0: i32) -> (i32, i32, i32) {
    %c0_i32 = arith.constant 0 : i32
    %c0_i32_0 = arith.constant 0 : i32
    %c0_i32_1 = arith.constant 0 : i32
    return %arg0, %c0_i32, %c0_i32_0 : i32, i32, i32
  }
  func.func @transform_1(%arg0: i32) -> (i32, i32) {
    %c0_i32 = arith.constant 0 : i32
    %c0_i32_0 = arith.constant 0 : i32
    %c0_i32_1 = arith.constant 0 : i32
    return %c0_i32, %c0_i32_0 : i32, i32
  }
  func.func @transform_2(%arg0: i32) -> (i32, i32) {
    %c0_i32 = arith.constant 0 : i32
    %c0_i32_0 = arith.constant 0 : i32
    %c0_i32_1 = arith.constant 0 : i32
    return %c0_i32, %c0_i32_0 : i32, i32
  }
  func.func @transform_3(%arg0: i32) -> (i32, i32) {
    %c0_i32 = arith.constant 0 : i32
    %c0_i32_0 = arith.constant 0 : i32
    %c0_i32_1 = arith.constant 0 : i32
    return %c0_i32, %c0_i32_0 : i32, i32
  }
  func.func @transform_4(%arg0: i32) -> (i32, i32) {
    %c0_i32 = arith.constant 0 : i32
    %c0_i32_0 = arith.constant 0 : i32
    %c0_i32_1 = arith.constant 0 : i32
    return %c0_i32, %c0_i32_0 : i32, i32
  }
  func.func @transform_5(%arg0: i32) -> (i32, i32) {
    %c0_i32 = arith.constant 0 : i32
    %c0_i32_0 = arith.constant 0 : i32
    %c0_i32_1 = arith.constant 0 : i32
    return %c0_i32, %c0_i32_0 : i32, i32
  }
  func.func @transform_6(%arg0: i32) -> (i32, i32) {
    %c0_i32 = arith.constant 0 : i32
    %c0_i32_0 = arith.constant 0 : i32
    %c0_i32_1 = arith.constant 0 : i32
    return %c0_i32, %c0_i32_0 : i32, i32
  }
  func.func @transform_7(%arg0: i32) -> (i32, i32, i32) {
    %c0_i32 = arith.constant 0 : i32
    %c0_i32_0 = arith.constant 0 : i32
    %c0_i32_1 = arith.constant 0 : i32
    return %arg0, %c0_i32, %c0_i32_0 : i32, i32, i32
  }
  func.func @transform_8(%arg0: i32) -> (i32, i32, i32) {
    %c0_i32 = arith.constant 0 : i32
    %c0_i32_0 = arith.constant 0 : i32
    %c0_i32_1 = arith.constant 0 : i32
    return %arg0, %c0_i32, %c0_i32_0 : i32, i32, i32
  }
}

</mosaic_0001>

<bundles_post_ra>
// kernel: tpu_custom_call.1
= control target key start
LH: loop header
LB: loop body
LE: loop exit
PB: predicated region body
PF: predicated region fallthrough
CT: control target
= control target key end

     0   :  { %s1429_s0 = inlined_call_operand.vmem [shape: f32[2,12,256], index: 0, kind: input, shape index: {}]   ;;  %s1430_s1 = inlined_call_operand.vmem [shape: f32[32,12], index: 1, kind: input, shape index: {}]   ;;  %s1431_s2 = inlined_call_operand.vmem [shape: f32[32,1], index: 2, kind: input, shape index: {}]   ;;  %s1432_s3 = inlined_call_operand.vmem [shape: f32[1,256], index: 3, kind: input, shape index: {}]   ;;  %s1433_s4 = inlined_call_operand.vmem [shape: f32[1,256], index: 4, kind: input, shape index: {}]   ;;  %s1434_s5 = inlined_call_operand.vmem [shape: f32[32,1], index: 5, kind: input, shape index: {}]   ;;  %s1435_s6 = inlined_call_operand.<no memory space> [shape: f32[1,1], index: 6, kind: input, shape index: {}]   ;;  %s1436_s7 = inlined_call_operand.hbm [shape: f32[2,32,256], index: 7, kind: output, shape index: {0}]   ;;  %s1437_s8 = inlined_call_operand.hbm [shape: f32[2,1,256], index: 8, kind: output, shape index: {1}]  }
   0x1   :  { %v14_v0 = vstv %s1435_s6 }
   0x2   :  { %15 = vst [vmem:[#allocation2] sm:$0x1] %v14_v0 }
   0x3   :  { %16 = vsyncpa [#allocation4], 0 }
   0x4   :  { %18 = vsyncpa [#allocation4 + $0x1], 0 }
   0x5   :  { %19 = vsyncpa [#allocation6], 0 }
   0x6   :  { %21 = vsyncpa [#allocation6 + $0x1], 0  ;;  %s1144_s29 = smov 0   ;;  %s1146_s30 = smov 0  }
   0x7   :  { %s1148_s9 = smov 0   ;;  %s1150_s10 = smov 0  }
   0x8 LB: > { %s1165_s6 = sadd.s32 4294967295, %s1086_s10   ;;  %s877_s11 = sadd.s32 4294967294, %s1086_s10   ;;  %s1086_s10 = sphi %s1150_s10, %s1443_s10   ;;  %s1082_s9 = sphi %s1148_s9, %s1442_s9   ;;  %s1078_s30 = sphi %s1146_s30, %s1441_s30   ;;  %s1074_s29 = sphi %s1144_s29, %s1440_s29  }
   0x9   : > { %s1169_s12 = sadd.s32 1, %s1086_s10   ;;  %s186_s13 = sadd.s32 1, %s1082_s9 }
   0xa   : > { %s183_s14 = ssub.s32 %s1086_s10, %s1169_s12  ;;  %p196_p0 = scmp.ne.s32.totalorder %s1082_s9, %s1078_s30 }
   0xb   : > { %p184_p1 = scmp.eq.s32.totalorder %s183_s14, 0  ;;  %p197_p2 = scmp.eq.s32.totalorder %s1165_s6, 1 }
   0xc   : > { %p202_p3 = scmp.ne.s32.totalorder %s1078_s30, %s1074_s29  ;;  %p203_p4 = scmp.eq.s32.totalorder %s877_s11, 1 }
   0xd   : > { %s1180_s15 = scalar_select %p184_p1, %s1082_s9, %s186_s13  }
   0xe   : > { %p1182_p5 = por %p197_p2, %p196_p0  ;;  %p1186_p6 = por %p203_p4, %p202_p3 }
   0xf   : > { %p880_p7 = scmp.ge.s32.totalorder %s1086_s10, 1  ;;  %p273_p8 = scmp.lt.s32.totalorder %s1086_s10, 3 }
  0x11   : > { %p274_p9 = pnand %p880_p7, %p273_p8 }
  0x12   : > { %p312_p10 = scmp.lt.s32.totalorder (!%p274_p9), %s1165_s6, 1  ;;  %v1088_v1 = vmov (!%p274_p9), 0.0   ;;  %vm369_vm0 = vcmask (!%p274_p9), 1043456   ;;  %v1089_v2 = vmov (!%p274_p9), 0   ;;  %v323_v3 = vld [vmem:[%s1431_s2 + $0x10] sm:$0xff] (!%p274_p9)  ;;  %v324_v4 = vld [vmem:[%s1431_s2 + $0x18] sm:$0xff] (!%p274_p9) }
  0x13   : > { %277 = sbr.rel (%p274_p9) target bundleno = 590 (0x24e), region = 48  ;;  %440 = vmatprep.mubr.f32.mxu0 (!%p274_p9), %v1088_v1  ;;  %452 = vmatprep.mubr.f32.mxu1 (!%p274_p9), %v1088_v1  ;;  %v321_v5 = vld [vmem:[%s1431_s2] sm:$0xff] (!%p274_p9)  ;;  %vm1090_vm1 = vmmov (!%p274_p9), 1   ;;  %v322_v13 = vld [vmem:[%s1431_s2 + $0x8] sm:$0xff] (!%p274_p9)  ;;  %vm356_vm3 = vcmask (!%p274_p9), 97280   ;;  %v319_v15 = vld [vmem:[%s1430_s1 + $0x10] sm:$0xff] (!%p274_p9) }
  0x14   : > { %961 = vset.pattern.permute.xlu1 (!%p274_p9), %v1089_v2  ;;  %960 = vset.pattern.permute.xlu0 (!%p274_p9), %v1089_v2  ;;  %vm903_vm2 = vmpackc.low (!%p274_p9), %vm369_vm0, %vm1090_vm1  ;;  %v327_v12 = vld [vmem:[%s1434_s5] sm:$0xff] (!%p274_p9)  ;;  %v328_v16 = vld [vmem:[%s1434_s5 + $0x8] sm:$0xff] (!%p274_p9)  ;;  %s900_s25 = sshll.u32 (!%p274_p9), %s1165_s6, 10  ;;  %s1092_s19 = smov (!%p274_p9), [#allocation3]  }
  0x15   : > { %348 = vperm.xlu1 (!%p274_p9), %961, %v323_v3   ;;  %338 = vperm.xlu0 (!%p274_p9), %960, %v321_v5   ;;  %v317_v14 = vld [vmem:[%s1430_s1] sm:$0xff] (!%p274_p9)  ;;  %v318_v17 = vld [vmem:[%s1430_s1 + $0x8] sm:$0xff] (!%p274_p9)  ;;  %v320_v18 = vld [vmem:[%s1430_s1 + $0x18] sm:$0xff] (!%p274_p9)  ;;  %s1341_s13 = scalar_lea.hbm (!%p274_p9), %s1436_s7, %s900_s25  ;;  %s996_s20 = sshll.u32 (!%p274_p9), %s1092_s19, 4  ;;  %s997_s20 = int_to_ptr.vmem [resolvable:$false] %s996_s20 }
  0x16   : > { %v329_v19 = vld [vmem:[%s1434_s5 + $0x10] sm:$0xff] (!%p274_p9)  ;;  %v330_v20 = vld [vmem:[%s1434_s5 + $0x18] sm:$0xff] (!%p274_p9)  ;;  %v331_v21 = vld [vmem:[#allocation2] sm:$0x1] (!%p274_p9)  ;;  %s998_s22 = scalar_lea.vmem (!%p274_p9), %s997_s20, 2048 }
  0x19   : > { %353 = vperm.xlu1 (!%p274_p9), %961, %v324_v4   ;;  %343 = vperm.xlu0 (!%p274_p9), %960, %v322_v13  }
  0x1a   : > { %s313_s18 = scalar_select %p312_p10, %s1165_s6, 1 }
  0x1c   : > { %s899_s21 = sshll.u32 %s313_s18, 5 }
  0x1d   : > { %s316_s28 = scalar_lea.vmem %s1429_s0, %s899_s21  ;;  %656 = vperm.xlu1 %961, %v327_v12   ;;  %s1315_s21 = sand.u32 1, %s1078_s30  }
  0x1e   : > { %v333_v6 = vld [vmem:[%s316_s28 + $0x8] sm:$0xff]  ;;  %v335_v7 = vld [vmem:[%s316_s28 + $0x18] sm:$0xf]  ;;  %v332_v8 = vld [vmem:[%s316_s28] sm:$0xff]  ;;  %s881_s24 = sshll.u32 %s1315_s21, 6  ;;  %s751_s14 = scalar_lea.sflag [#allocation4], %s1315_s21 }
  0x1f   : > { %v902_v9 = vpack.c.bf16 %v335_v7, %v333_v6  ;;  %v334_v10 = vld [vmem:[%s316_s28 + $0x10] sm:$0xf]  ;;  %s1327_s26 = scalar_lea.vmem [#allocation3], %s881_s24 }
  0x20   : > { %v905_v11 = vpack.c.bf16 %v334_v10, %v332_v8  ;;  %s769_s27 = sshll.u32 %s1327_s26, 4  ;;  %s1343_s27 = int_to_ptr.vmem [resolvable:$true] %s769_s27 }
  0x21   : > { %904 = vmatprep.subr.msk.bf16.mxu0 %vm903_vm2, %v902_v9  ;;  %908 = vmatprep.subr.msk.bf16.mxu1 %vm903_vm2, %v902_v9  ;;  %s992_s18 = scalar_lea.vmem %s1343_s27, 1024  ;;  %p999_p0 = scmp.lt.s32.totalorder %s1343_s27, %s997_s20 }
  0x22   : > { %907 = vmatpush1.bf16.msk.msra.mxu0 %vm903_vm2, %v905_v11  ;;  %909 = vmatpush1.bf16.msk.msra.mxu1 %vm903_vm2, %v905_v11  ;;  %p993_p11 = scmp.ne.s32.totalorder %s1343_s27, %s992_s18  ;;  %p1000_p1 = scmp.lt.s32.totalorder %s998_s22, %s992_s18 }
  0x23   : > { %661 = vperm.xlu1 %961, %v328_v16  }
  0x24   : > { %p994_p12 = pnand %p993_p11, %p1182_p5  ;;  %p1001_p2 = por %p1000_p1, %p999_p0 }
  0x25   : > { %887 = vmatmul.mubr.msk.f32.vlgmr.msra.gmra.mrb[0].mxu0 %vm356_vm3, %v317_v14  ;;  %889 = vmatmul.mubr.msk.f32.vlgmr.msra.gmra.mrb[0].mxu1 %vm356_vm3, %v319_v15 }
  0x26   : > { %446 = vmatprep.mubr.f32.mxu0 %v1088_v1  ;;  %458 = vmatprep.mubr.f32.mxu1 %v1088_v1  ;;  %p995_p13 = pneg %p994_p12 }
  0x27   : > { %666 = vperm.xlu1 %961, %v329_v19  }
  0x28   : > { %p1002_p3 = pnand %p1001_p2, %p995_p13 }
  0x29   : > { %888 = vmatmul.mubr.msk.f32.gmra.mrb[2].mxu0 %vm356_vm3, %v318_v17  ;;  %890 = vmatmul.mubr.msk.f32.gmra.mrb[2].mxu1 %vm356_vm3, %v320_v18 }
  0x2b   : > { %671 = vperm.xlu1 %961, %v330_v20  }
  0x2f   : > { %702 = vperm.xlu1 %961, %v331_v21  }
  0x94   : > { %v349_v22 = vpop.permute.xlu1 %348  ;;  %v339_v23 = vpop.permute.xlu0 %338 }
  0x98   : > { %v354_v34 = vpop.permute.xlu1 %353  ;;  %v344_v35 = vpop.permute.xlu0 %343 }
  0xf8   : > { %v442_v24 = vpop.f32.mrb[0].mxu0  ;;  %v454_v25 = vpop.f32.mrb[0].mxu1 }
  0xf9   : > { %v1233_v26 = vadd.f32 %v442_v24, %v339_v23  ;;  %v1235_v27 = vadd.f32 %v454_v25, %v349_v22  ;;  %v444_v28 = vpop.f32.mrb[1].mxu0  ;;  %v456_v29 = vpop.f32.mrb[1].mxu1 }
  0xfa   : > { %v1237_v30 = vadd.f32 %v444_v28, %v339_v23  ;;  %v1239_v31 = vadd.f32 %v456_v29, %v349_v22 }
  0xfb   : > { %v473_v32 = vmul.f32 0.044715, %v1233_v26  ;;  %v477_v33 = vmul.f32 0.044715, %v1235_v27  ;;  %v465_v23 = vmul.f32 0.5, %v1233_v26 }
  0xfc   : > { %v474_v36 = vmul.f32 0.044715, %v1237_v30  ;;  %v478_v37 = vmul.f32 0.044715, %v1239_v31  ;;  %v448_v40 = vpop.f32.mrb[2].mxu0  ;;  %v460_v41 = vpop.f32.mrb[2].mxu1 }
  0xfd   : > { %v481_v38 = vmul.f32 %v473_v32, %v1233_v26  ;;  %v485_v39 = vmul.f32 %v477_v33, %v1235_v27  ;;  %v449_v44 = vadd.f32 %v448_v40, %v344_v35  ;;  %v1249_v45 = vadd.f32 %v460_v41, %v354_v34  ;;  %v450_v46 = vpop.f32.mrb[3].mxu0  ;;  %v462_v47 = vpop.f32.mrb[3].mxu1 }
  0xfe   : > { %v482_v42 = vmul.f32 %v474_v36, %v1237_v30  ;;  %v486_v43 = vmul.f32 %v478_v37, %v1239_v31  ;;  %v451_v50 = vadd.f32 %v450_v46, %v344_v35  ;;  %v1258_v57 = vadd.f32 %v462_v47, %v354_v34 }
  0xff   : > { %v489_v48 = vmul.f32 %v481_v38, %v1233_v26  ;;  %v493_v49 = vmul.f32 %v485_v39, %v1235_v27  ;;  %v475_v53 = vmul.f32 0.044715, %v449_v44  ;;  %v479_v56 = vmul.f32 0.044715, %v1249_v45 }
 0x100   : > { %v490_v51 = vmul.f32 %v482_v42, %v1237_v30  ;;  %v494_v52 = vmul.f32 %v486_v43, %v1239_v31  ;;  %v476_v0 = vmul.f32 0.044715, %v451_v50  ;;  %v480_v6 = vmul.f32 0.044715, %v1258_v57 }
 0x101   : > { %v497_v54 = vadd.f32 %v489_v48, %v1233_v26  ;;  %v501_v55 = vadd.f32 %v493_v49, %v1235_v27  ;;  %v483_v60 = vmul.f32 %v475_v53, %v449_v44  ;;  %v487_v63 = vmul.f32 %v479_v56, %v1249_v45 }
 0x102   : > { %v498_v58 = vadd.f32 %v490_v51, %v1237_v30  ;;  %v502_v59 = vadd.f32 %v494_v52, %v1239_v31  ;;  %v484_v5 = vmul.f32 %v476_v0, %v451_v50  ;;  %v488_v10 = vmul.f32 %v480_v6, %v1258_v57 }
 0x103   : > { %v505_v61 = vmul.f32 0.7978846, %v497_v54  ;;  %v509_v62 = vmul.f32 0.7978846, %v501_v55  ;;  %v491_v3 = vmul.f32 %v483_v60, %v449_v44  ;;  %v495_v4 = vmul.f32 %v487_v63, %v1249_v45 }
 0x104   : > { %v506_v1 = vmul.f32 0.7978846, %v498_v58  ;;  %v510_v2 = vmul.f32 0.7978846, %v502_v59  ;;  %v492_v9 = vmul.f32 %v484_v5, %v451_v50  ;;  %v496_v14 = vmul.f32 %v488_v10, %v1258_v57 }
 0x105   : > { %962 = vtanh.f32 %v505_v61  ;;  %v499_v7 = vadd.f32 %v491_v3, %v449_v44  ;;  %v503_v8 = vadd.f32 %v495_v4, %v1249_v45  ;;  %v469_v33 = vmul.f32 0.5, %v1235_v27 }
 0x106   : > { %964 = vtanh.f32 %v509_v62  ;;  %v500_v13 = vadd.f32 %v492_v9, %v451_v50  ;;  %v504_v16 = vadd.f32 %v496_v14, %v1258_v57  ;;  %v467_v34 = vmul.f32 0.5, %v449_v44 }
 0x107   : > { %966 = vtanh.f32 %v506_v1  ;;  %v507_v11 = vmul.f32 0.7978846, %v499_v7  ;;  %v511_v12 = vmul.f32 0.7978846, %v503_v8  ;;  %v466_v36 = vmul.f32 0.5, %v1237_v30 }
 0x108   : > { %968 = vtanh.f32 %v510_v2  ;;  %v508_v15 = vmul.f32 0.7978846, %v500_v13  ;;  %v512_v17 = vmul.f32 0.7978846, %v504_v16  ;;  %v471_v26 = vmul.f32 0.5, %v1249_v45 }
 0x109   : > { %970 = vtanh.f32 %v507_v11  ;;  %v470_v43 = vmul.f32 0.5, %v1239_v31  ;;  %v468_v46 = vmul.f32 0.5, %v451_v50  ;;  %v472_v45 = vmul.f32 0.5, %v1258_v57 }
 0x10a   : > { %972 = vtanh.f32 %v511_v12 }
 0x10b   : > { %974 = vtanh.f32 %v508_v15 }
 0x10c   : > { %976 = vtanh.f32 %v512_v17 }
 0x10f   : > { %v963_v18 = vpop.eup %962 }
 0x110   : > { %v965_v19 = vpop.eup %964  ;;  %v521_v21 = vadd.f32 1.0, %v963_v18 }
 0x111   : > { %v967_v20 = vpop.eup %966  ;;  %v525_v24 = vadd.f32 1.0, %v965_v19 }
 0x112   : > { %v969_v22 = vpop.eup %968  ;;  %v522_v28 = vadd.f32 1.0, %v967_v20  ;;  %v1270_v32 = vmul.f32 %v521_v21, %v465_v23 }
 0x113   : > { %v971_v25 = vpop.eup %970  ;;  %v526_v37 = vadd.f32 1.0, %v969_v22  ;;  %v1274_v40 = vmul.f32 %v525_v24, %v469_v33 }
 0x114   : > { %v973_v29 = vpop.eup %972  ;;  %v523_v35 = vadd.f32 1.0, %v971_v25  ;;  %v1279_v42 = vmul.f32 %v522_v28, %v466_v36  ;;  %v537_v44 = vmul.f32 %v1270_v32, %v1270_v32  ;;  %v1091_v28 = vmov 1966171168  }
 0x115   : > { %v527_v38 = vadd.f32 1.0, %v973_v29  ;;  %v975_v39 = vpop.eup %974  ;;  %v1288_v49 = vmul.f32 %v526_v37, %v470_v43  ;;  %v541_v31 = vmul.f32 %v1274_v40, %v1274_v40  ;;  %v592_v29 = vunpack.c.l.s4 %v1091_v28 }
 0x116   : > { %v1276_v41 = vmul.f32 %v523_v35, %v467_v34  ;;  %v524_v47 = vadd.f32 1.0, %v975_v39  ;;  %v977_v27 = vpop.eup %976  ;;  %v538_v53 = vmul.f32 %v1279_v42, %v1279_v42  ;;  %v594_v34 = vlaneseq }
 0x117   : > { %v1286_v48 = vmul.f32 %v527_v38, %v471_v26  ;;  %v528_v52 = vadd.f32 1.0, %v977_v27  ;;  %v542_v57 = vmul.f32 %v1288_v49, %v1288_v49  ;;  %v593_v36 = vunpack.c.0.s8 %v592_v29  ;;  %v657_v27 = vpop.permute.xlu1 %656 }
 0x118   : > { %v539_v30 = vmul.f32 %v1276_v41, %v1276_v41  ;;  %v1290_v51 = vmul.f32 %v524_v47, %v468_v46  ;;  %v595_v38 = vshrl.u32 %v594_v34, 7 }
 0x119   : > { %v1299_v55 = vmul.f32 %v528_v52, %v472_v45  ;;  %v543_v56 = vmul.f32 %v1286_v48, %v1286_v48 }
 0x11a   : > { %v545_v50 = vadd.f32 %v539_v30, %v537_v44  ;;  %v540_v54 = vmul.f32 %v1290_v51, %v1290_v51  ;;  %v1308_v26 = vsub.s32 %v593_v36, %v595_v38  ;;  %v325_v30 = vld [vmem:[%s1432_s3] sm:$0x3]  ;;  %v615_v52 = vsub.s32 1, %v595_v38 }
 0x11b   : > { %v544_v61 = vmul.f32 %v1299_v55, %v1299_v55 }
 0x11c   : > { %v546_v58 = vadd.f32 %v545_v50, %v541_v31  ;;  %v554_v59 = vadd.f32 %v540_v54, %v538_v53  ;;  %v662_v50 = vpop.permute.xlu1 %661  ;;  %v326_v53 = vld [vmem:[%s1433_s4] sm:$0x3]  ;;  %v1322_v54 = vsub.s32 0, %v595_v38 }
 0x11e   : > { %v547_v60 = vadd.f32 %v546_v58, %v543_v56  ;;  %v555_v62 = vadd.f32 %v554_v59, %v542_v57  ;;  %v631_v58 = vrot.slane %v326_v53, %v1322_v54  ;;  %v635_v57 = vrot.slane %v326_v53, %v615_v52 }
 0x120   : > { %v548_v63 = vrot.slane %v547_v60, 4  ;;  %v556_v0 = vadd.f32 %v555_v62, %v544_v61 }
 0x122   : > { %v549_v1 = vadd.f32 %v548_v63, %v547_v60  ;;  %v557_v2 = vrot.slane %v556_v0, 4 }
 0x124   : > { %v550_v3 = vrot.slane %v549_v1, 2  ;;  %v558_v4 = vadd.f32 %v557_v2, %v556_v0 }
 0x126   : > { %v551_v5 = vadd.f32 %v550_v3, %v549_v1  ;;  %v559_v6 = vrot.slane %v558_v4, 2  ;;  %v667_v1 = vpop.permute.xlu1 %666 }
 0x128   : > { %v552_v7 = vrot.slane %v551_v5, 1  ;;  %v560_v8 = vadd.f32 %v559_v6, %v558_v4 }
 0x12a   : > { %v553_v9 = vadd.f32 %v552_v7, %v551_v5  ;;  %v561_v10 = vrot.slane %v560_v8, 1 }
 0x12c   : > { %978 = vrsqrt.f32 %v553_v9  ;;  %v562_v11 = vadd.f32 %v561_v10, %v560_v8  ;;  %vm565_vm4 = vcmp.eq.f32.partialorder %v553_v9, inf  ;;  %v568_v16 = vand.u32 2147483648, %v553_v9 }
 0x12d   : > { %vm567_vm5 = vcmp.eq.f32.partialorder %v553_v9, 0.0 }
 0x12e   : > { %980 = vrsqrt.f32 %v562_v11  ;;  %vm572_vm6 = vcmp.eq.f32.partialorder %v562_v11, inf  ;;  %v575_v19 = vand.u32 2147483648, %v562_v11  ;;  %vm574_vm7 = vcmp.eq.f32.partialorder %v562_v11, 0.0 }
 0x136   : > { %v979_v12 = vpop.eup %978 }
 0x137   : > { %v564_v13 = vmul.f32 %v979_v12, %v553_v9 }
 0x138   : > { %v981_v14 = vpop.eup %980 }
 0x139   : > { %v566_v15 = vsel %vm565_vm4, %v553_v9, %v564_v13  ;;  %v571_v17 = vmul.f32 %v981_v14, %v562_v11 }
 0x13a   : > { %v569_v18 = vsel %vm567_vm5, %v568_v16, %v566_v15 }
 0x13b   : > { %v573_v20 = vsel %vm572_vm6, %v562_v11, %v571_v17 }
 0x13c   : > { %v576_v21 = vsel %vm574_vm7, %v575_v19, %v573_v20 }
 0x13d   : > { %v577_v22 = vadd.f32 %v576_v21, %v569_v18 }
 0x13f   : > { %578 = vadd.xlane.f32.xlu0 %v577_v22 }
 0x1cc   : > { %v579_v23 = vpop.xlane.xlu0 %578 }
 0x1cd   : > { %v580_v24 = vmul.f32 0.00390625, %v579_v23 }
 0x1cf   : > { %v581_v25 = vadd.f32 1e-06, %v580_v24 }
 0x1d1   : > { %982 = vrcp.f32 %v581_v25 }
 0x1db   : > { %v983_v33 = vpop.eup %982 }
 0x1dc   : > { %v583_v35 = vmul.f32 %v983_v33, %v581_v25 }
 0x1de   : > { %v584_v37 = vsub.f32 2.0, %v583_v35 }
 0x1e0   : > { %v585_v39 = vmul.f32 %v983_v33, %v584_v37 }
 0x1e2   : > { %v586_v43 = vmul.f32 %v585_v39, %v569_v18  ;;  %v587_v46 = vmul.f32 %v585_v39, %v576_v21 }
 0x1e4   : > { %v590_v47 = vcombine.low %v586_v43, %v587_v46 }
 0x1e6   : > { %v597_v44 = vrot.slane %v590_v47, %v1308_v26 }
 0x1e8   : > { %v604_v45 = vrot.slane %v597_v44, %v1308_v26 }
 0x1ea   : > { %v606_v31 = vmul.f32 %v604_v45, %v325_v30 }
 0x1ec   : > { %v607_v56 = vadd.f32 1.0, %v606_v31 }
 0x1ee   : > { %v612_v59 = vrot.slane %v607_v56, %v1322_v54  ;;  %v616_v60 = vrot.slane %v607_v56, %v615_v52 }
 0x1f0   : > { %v619_v61 = vmul.f32 %v612_v59, %v1270_v32  ;;  %v620_v62 = vmul.f32 %v616_v60, %v1279_v42  ;;  %v621_v63 = vmul.f32 %v612_v59, %v1276_v41  ;;  %v622_v0 = vmul.f32 %v616_v60, %v1290_v51 }
 0x1f1   : > { %v623_v2 = vmul.f32 %v612_v59, %v1274_v40  ;;  %v624_v3 = vmul.f32 %v616_v60, %v1288_v49  ;;  %v625_v4 = vmul.f32 %v612_v59, %v1286_v48  ;;  %v626_v5 = vmul.f32 %v616_v60, %v1299_v55 }
 0x1f2   : > { %v638_v32 = vadd.f32 %v631_v58, %v619_v61  ;;  %v639_v6 = vadd.f32 %v635_v57, %v620_v62  ;;  %v640_v42 = vadd.f32 %v631_v58, %v621_v63  ;;  %v641_v41 = vadd.f32 %v635_v57, %v622_v0 }
 0x1f3   : > { %v642_v40 = vadd.f32 %v631_v58, %v623_v2  ;;  %v643_v49 = vadd.f32 %v635_v57, %v624_v3  ;;  %v644_v48 = vadd.f32 %v631_v58, %v625_v4  ;;  %v645_v51 = vadd.f32 %v635_v57, %v626_v5 }
 0x1f4   : > { %646 = vst [vmem:[%s1327_s26] sm:$0xff] %v638_v32  ;;  %647 = vst [vmem:[%s1327_s26 + $0x8] sm:$0xff] %v639_v6  ;;  %v674_v55 = vmul.f32 %v657_v27, %v638_v32  ;;  %v675_v7 = vmul.f32 %v657_v27, %v639_v6  ;;  %v676_v8 = vmul.f32 %v662_v50, %v640_v42 }
 0x1f5   : > { %648 = vst [vmem:[%s1327_s26 + $0x10] sm:$0xff] %v640_v42  ;;  %649 = vst [vmem:[%s1327_s26 + $0x18] sm:$0xff] %v641_v41  ;;  %v677_v9 = vmul.f32 %v662_v50, %v641_v41  ;;  %v678_v10 = vmul.f32 %v667_v1, %v642_v40  ;;  %v679_v11 = vmul.f32 %v667_v1, %v643_v49 }
 0x1f6   : > { %650 = vst [vmem:[%s1327_s26 + $0x20] sm:$0xff] %v642_v40  ;;  %651 = vst [vmem:[%s1327_s26 + $0x28] sm:$0xff] %v643_v49  ;;  %v682_v12 = vadd.f32 %v676_v8, %v674_v55 }
 0x1f7   : > { %652 = vst [vmem:[%s1327_s26 + $0x30] sm:$0xff] %v644_v48  ;;  %653 = vst [vmem:[%s1327_s26 + $0x38] sm:$0xff] %v645_v51  ;;  %v691_v13 = vadd.f32 %v677_v9, %v675_v7 }
 0x1f8   : > { %1005 = shalt.err (!%p1002_p3)
}
 0x1f9   : > { %s1006_s23 = scalar_lea.hbm %s1341_s13, 1024  ;;  %s1010_s26 = scalar_lea.hbm %s1436_s7, 2048 }
 0x1fa   : > { %p1007_p4 = scmp.ne.s32.totalorder %s1341_s13, %s1006_s23  ;;  %p1011_p9 = scmp.lt.u32.totalorder %s1341_s13, %s1436_s7 }
 0x1fb   : > { %p1012_p10 = scmp.lt.u32.totalorder %s1010_s26, %s1006_s23  ;;  %p1014_p12 = scmp.lt.u32.totalorder %s1006_s23, %s1341_s13 }
 0x1fc   : > { %p1008_p7 = pnand %p1007_p4, %p1182_p5 }
 0x1fd   : > { %p1013_p11 = por %p1012_p10, %p1011_p9 }
 0x1fe   : > { %p1009_p8 = pneg %p1008_p7 }
 0x1ff   : > { %p1015_p13 = por %p1014_p12, %p1013_p11 }
 0x201   : > { %p1016_p0 = pnand %p1015_p13, %p1009_p8 }
 0x203   : > { %1019 = shalt.err (!%p1016_p0)
}
 0x204   : > { %s1093_s18 = smov 256   ;;  %s1094_s19 = smov 16   ;;  %v672_v14 = vpop.permute.xlu1 %671  ;;  %v683_v17 = vadd.f32 %v682_v12, %v678_v10  ;;  %v692_v18 = vadd.f32 %v691_v13, %v679_v11  ;;  %vm747_vm8 = vcmp.lt.s32.totalorder %v594_v34, 256 }
 0x205   : > { %910 = dma.vmem_to_hbm [thread:$0]  (%p1182_p5), %s1343_s27, 1024, %s1341_s13, %s751_s14, %s1093_s18, %s1093_s18, %s1094_s19   ;;  %v680_v15 = vmul.f32 %v672_v14, %v644_v48  ;;  %v681_v16 = vmul.f32 %v672_v14, %v645_v51 }
 0x206   : > { %s882_s27 = sshll.u32 %s1315_s21, 1  ;;  %s901_s13 = sshll.u32 %s1165_s6, 5 }
 0x207   : > { %v684_v19 = vadd.f32 %v683_v17, %v680_v15  ;;  %v693_v20 = vadd.f32 %v692_v18, %v681_v16  ;;  %s311_s14 = scalar_lea.vmem [#allocation5], %s882_s27  ;;  %s1386_s24 = scalar_lea.hbm %s1437_s8, %s901_s13 }
 0x208   : > { %v703_v35 = vpop.permute.xlu1 %702  ;;  %s786_s20 = sshll.u32 %s311_s14, 4  ;;  %s756_s6 = scalar_lea.sflag [#allocation6], %s1315_s21  ;;  %s1388_s20 = int_to_ptr.vmem [resolvable:$true] %s786_s20 }
 0x209   : > { %v685_v21 = vrot.slane %v684_v19, 4  ;;  %v694_v22 = vrot.slane %v693_v20, 4  ;;  %v708_v38 = vrot.slane %v703_v35, %v1322_v54  ;;  %s1020_s25 = scalar_lea.vmem %s1388_s20, 32  ;;  %s1095_s26 = smov [#allocation5]  }
 0x20a   : > { %p1021_p1 = scmp.ne.s32.totalorder %s1388_s20, %s1020_s25  ;;  %s1024_s28 = sshll.u32 %s1095_s26, 4  ;;  %s1025_s28 = int_to_ptr.vmem [resolvable:$false] %s1024_s28 }
 0x20b   : > { %v686_v23 = vadd.f32 %v685_v21, %v684_v19  ;;  %v695_v24 = vadd.f32 %v694_v22, %v693_v20  ;;  %s1026_s11 = scalar_lea.vmem %s1025_s28, 64  ;;  %p1027_p4 = scmp.lt.s32.totalorder %s1388_s20, %s1025_s28 }
 0x20c   : > { %p1022_p2 = pnand %p1021_p1, %p1182_p5  ;;  %p1028_p7 = scmp.lt.s32.totalorder %s1026_s11, %s1020_s25 }
 0x20d   : > { %v687_v25 = vrot.slane %v686_v23, 2  ;;  %v696_v28 = vrot.slane %v695_v24, 2 }
 0x20e   : > { %p1023_p3 = pneg %p1022_p2  ;;  %p1029_p8 = por %p1028_p7, %p1027_p4 }
 0x20f   : > { %v688_v29 = vadd.f32 %v687_v25, %v686_v23  ;;  %v697_v33 = vadd.f32 %v696_v28, %v695_v24 }
 0x210   : > { %p1030_p9 = pnand %p1029_p8, %p1023_p3 }
 0x211   : > { %v689_v36 = vrot.slane %v688_v29, 1  ;;  %v698_v37 = vrot.slane %v697_v33, 1 }
 0x213   : > { %v690_v39 = vadd.f32 %v689_v36, %v688_v29  ;;  %v699_v43 = vadd.f32 %v698_v37, %v697_v33 }
 0x215   : > { %v709_v46 = vadd.f32 %v708_v38, %v690_v39  ;;  %v710_v47 = vadd.f32 %v708_v38, %v699_v43 }
 0x217   : > { %v711_v27 = vsub.f32 0.0, %v709_v46  ;;  %v712_v44 = vsub.f32 0.0, %v710_v47 }
 0x219   : > { %v713_v30 = vmul.f32 1.442695, %v711_v27  ;;  %v715_v45 = vmul.f32 1.442695, %v712_v44 }
 0x21b   : > { %984 = vpow2.f32 %v713_v30 }
 0x21c   : > { %986 = vpow2.f32 %v715_v45 }
 0x225   : > { %v985_v52 = vpop.eup %984 }
 0x226   : > { %v987_v31 = vpop.eup %986  ;;  %v717_v50 = vadd.f32 1.0, %v985_v52 }
 0x227   : > { %v718_v53 = vadd.f32 1.0, %v987_v31 }
 0x228   : > { %988 = vrcp.f32 %v717_v50 }
 0x229   : > { %990 = vrcp.f32 %v718_v53 }
 0x232   : > { %v989_v56 = vpop.eup %988 }
 0x233   : > { %v991_v54 = vpop.eup %990  ;;  %v721_v58 = vmul.f32 %v989_v56, %v717_v50 }
 0x234   : > { %v722_v57 = vmul.f32 %v991_v54, %v718_v53 }
 0x235   : > { %v723_v59 = vsub.f32 2.0, %v721_v58 }
 0x236   : > { %v724_v60 = vsub.f32 2.0, %v722_v57 }
 0x237   : > { %v725_v61 = vmul.f32 %v989_v56, %v723_v59 }
 0x238   : > { %v726_v62 = vmul.f32 %v991_v54, %v724_v60 }
 0x23a   : > { %v729_v63 = vcombine.low %v725_v61, %v726_v62 }
 0x23c   : > { %v736_v0 = vrot.slane %v729_v63, %v1308_v26 }
 0x23e   : > { %v743_v1 = vrot.slane %v736_v0, %v1308_v26 }
 0x240   : > { %749 = vst.msk [vmem:[%s311_s14] sm:$0x3] %vm747_vm8, %v743_v1 }
 0x241   : > { %1033 = shalt.err (!%p1030_p9)
}
 0x242   : > { %s1034_s21 = scalar_lea.hbm %s1386_s24, 32  ;;  %s1038_s27 = scalar_lea.hbm %s1437_s8, 64 }
 0x243   : > { %p1035_p10 = scmp.ne.s32.totalorder %s1386_s24, %s1034_s21  ;;  %p1039_p13 = scmp.lt.u32.totalorder %s1386_s24, %s1437_s8 }
 0x244   : > { %p1040_p0 = scmp.lt.u32.totalorder %s1038_s27, %s1034_s21  ;;  %p1042_p2 = scmp.lt.u32.totalorder %s1034_s21, %s1386_s24 }
 0x245   : > { %p1036_p11 = pnand %p1035_p10, %p1182_p5 }
 0x246   : > { %p1041_p1 = por %p1040_p0, %p1039_p13 }
 0x247   : > { %p1037_p12 = pneg %p1036_p11 }
 0x248   : > { %p1043_p3 = por %p1042_p2, %p1041_p1 }
 0x24a   : > { %p1044_p4 = pnand %p1043_p3, %p1037_p12 }
 0x24c   : > { %1047 = shalt.err (!%p1044_p4)
}
 0x24d   : > { %911 = dma.vmem_to_hbm [thread:$0]  (%p1182_p5), %s1388_s20, 32, %s1386_s24, %s756_s6  }
 0x24e PF: > { %p921_p7 = scmp.ge.s32.totalorder %s1086_s10, 2  ;;  %s798_s22 = sand.u32 1, %s1074_s29  }
 0x24f   : > { %s799_s23 = scalar_lea.sflag [#allocation4], %s798_s22 }
 0x250   : > { %p915_p8 = pnand %p921_p7, %p1186_p6 }
 0x252   : > { %1065 = dma.done.wait (!%p915_p8), %s799_s23, 1024  }
 0x253   : > { %1067 = vsyncadd (!%p915_p8), %s799_s23, 4294966272  ;;  %s808_s25 = scalar_lea.sflag [#allocation6], %s798_s22 }
 0x254   : > { %1069 = dma.done.wait (!%p915_p8), %s808_s25, 32  }
 0x255   : > { %1071 = vsyncadd (!%p915_p8), %s808_s25, 4294967264  ;;  %p24_p5 = scmp.ge.s32.totalorder %s1169_s12, 4   ;;  %s1440_s29 = smov %s1078_s30 }
 0x256   : > { %s1441_s30 = smov %s1082_s9  ;;  %s1442_s9 = smov %s1180_s15 }
 0x257   : > { %s1443_s10 = smov %s1169_s12  ;;  %26 = sbr.rel (!%p24_p5) target bundleno = 8 (0x8), region = 100 }
 0x25e   :  { %813 = vsyncpa [#allocation4], 1 }
 0x25f   :  { %815 = vsyncpa [#allocation4 + $0x1], 1 }
 0x260   :  { %816 = vsyncpa [#allocation6], 1 }
 0x261   :  { %818 = vsyncpa [#allocation6 + $0x1], 1 }

</bundles_post_ra>
